<compile_context>
chip_gen: v6e
topology: v6e:2x2x1
jax: 0.10.0
libtpu: 0.0.40
codegen_flags: <defaults>
</compile_context>

<pallas_src>
import jax
import jax.numpy as jnp
import numpy as np
from jax.experimental import pallas as pl
from jax.experimental.pallas import tpu as pltpu

HIDDEN = 64
MAX_TILE_B = 1024   # max rows per grid step (always a multiple of 8)


def _round_up(x, m):
    return ((x + m - 1) // m) * m


def _choose_tile_b(batch):
    b8 = _round_up(max(batch, 1), 8)
    return min(b8, MAX_TILE_B)


def _orthogonal(key, out_dim, in_dim, gain):
    """Deterministic orthogonal init, same spirit as torch.nn.init.orthogonal_."""
    init = jax.nn.initializers.orthogonal(scale=gain)
    w = init(key, (out_dim, in_dim), jnp.float32)  # torch layout (out, in)
    return w.T                                     # stored as (in, out) for x @ W


def _mlp_actor_kernel(x_ref, w1_ref, b1_ref, w2_ref, b2_ref, w3_ref, b3_ref,
                      o_ref):
    # Layer 1: (TB, D) @ (D, 64) + (1, 64) -> tanh   (MXU + EUP)
    h = jnp.tanh(
        jnp.dot(x_ref[...], w1_ref[...], preferred_element_type=jnp.float32)
        + b1_ref[...])
    # Layer 2: (TB, 64) @ (64, 64) + (1, 64) -> tanh
    h = jnp.tanh(
        jnp.dot(h, w2_ref[...], preferred_element_type=jnp.float32)
        + b2_ref[...])
    # Layer 3: (TB, 64) @ (64, A) + (1, A) -> logits
    logits = (jnp.dot(h, w3_ref[...], preferred_element_type=jnp.float32)
              + b3_ref[...])
    o_ref[...] = logits.astype(o_ref.dtype)


def mlp_actor_forward(x, params):
    """x: (B, D_in) float32 -> logits (B, n_actions) float32."""
    w1, b1, w2, b2, w3, b3 = params
    B, D = x.shape
    A = w3.shape[1]

    # Batch tiling: pad B up to a multiple of tile_b (padded rows sliced off).
    tile_b = _choose_tile_b(B)
    B_pad = _round_up(B, tile_b)
    if B_pad != B:
        x = jnp.pad(x, ((0, B_pad - B), (0, 0)))
    num_tiles = B_pad // tile_b

    def tiled(shape):          # tiled along the batch axis (auto double-buffered)
        return pl.BlockSpec(shape, lambda i: (i, 0))

    def resident(shape):       # constant block index -> fetched once, stays in VMEM
        return pl.BlockSpec(shape, lambda i: (0, 0))

    out = pl.pallas_call(
        _mlp_actor_kernel,
        out_shape=jax.ShapeDtypeStruct((B_pad, A), jnp.float32),
        grid=(num_tiles,),
        in_specs=[
            tiled((tile_b, D)),
            resident((D, HIDDEN)),
            resident((1, HIDDEN)),
            resident((HIDDEN, HIDDEN)),
            resident((1, HIDDEN)),
            resident((HIDDEN, A)),
            resident((1, A)),
        ],
        out_specs=tiled((tile_b, A)),
        compiler_params=pltpu.CompilerParams(
            dimension_semantics=("parallel",)),
    )(x, w1, b1, w2, b2, w3, b3)

    return out if B_pad == B else out[:B]


def init_params(key, obs_dim, n_actions):
    k1, k2, k3 = jax.random.split(key, 3)
    gain = float(np.sqrt(2.0))
    w1 = _orthogonal(k1, HIDDEN, obs_dim, gain)        # (obs_dim, 64)
    b1 = jnp.zeros((1, HIDDEN), jnp.float32)
    w2 = _orthogonal(k2, HIDDEN, HIDDEN, gain)         # (64, 64)
    b2 = jnp.zeros((1, HIDDEN), jnp.float32)
    w3 = _orthogonal(k3, n_actions, HIDDEN, 0.01)      # (64, n_actions)
    b3 = jnp.zeros((1, n_actions), jnp.float32)
    return (w1, b1, w2, b2, w3, b3)


def reference_forward(x, params):
    """Host-side float64 reference (independent of TPU matmul precision)."""
    w1, b1, w2, b2, w3, b3 = (np.asarray(p, np.float64) for p in params)
    x = np.asarray(x, np.float64)
    h1 = np.tanh(x @ w1 + b1)
    h2 = np.tanh(h1 @ w2 + b2)
    return (h2 @ w3 + b3).astype(np.float32)


if __name__ == "__main__":
    key = jax.random.PRNGKey(0)
    k_param, kx1, kx2, kx3 = jax.random.split(key, 4)

    obs_dim = 16       # np.prod(env.observation_space.shape)
    n_actions = 6      # env.action_space.n
    params = init_params(k_param, obs_dim, n_actions)

    fwd = jax.jit(mlp_actor_forward)

    cases = (
        ("single-tile", 8, kx1),       # exact single tile
        ("batch-pad", 10, kx2),        # batch not a multiple of 8 -> padding path
        ("multi-tile", 1040, kx3),     # > MAX_TILE_B -> 2 grid steps + padding
    )
    for name, batch, k in cases:
        x = jax.random.normal(k, (batch, obs_dim), dtype=jnp.float32)
        logits = jax.block_until_ready(fwd(x, params))
        ref = reference_forward(x, params)
        assert logits.shape == (batch, n_actions), (name, logits.shape)
        np.testing.assert_allclose(np.asarray(logits), ref,
                                   rtol=2e-2, atol=2e-3, err_msg=name)

    print("KERNEL_OK")
</pallas_src>

<mosaic_0001>
module attributes {stable_mosaic.version = 11 : i64} {
  func.func @_mlp_actor_kernel(%arg0: i32, %arg1: memref<8x16xf32, #tpu.memory_space<vmem>>, %arg2: memref<16x64xf32, #tpu.memory_space<vmem>>, %arg3: memref<1x64xf32, #tpu.memory_space<vmem>>, %arg4: memref<64x64xf32, #tpu.memory_space<vmem>>, %arg5: memref<1x64xf32, #tpu.memory_space<vmem>>, %arg6: memref<64x6xf32, #tpu.memory_space<vmem>>, %arg7: memref<1x6xf32, #tpu.memory_space<vmem>>, %arg8: memref<8x6xf32, #tpu.memory_space<vmem>>) attributes {dimension_semantics = [#tpu.dimension_semantics<parallel>], iteration_bounds = array<i64: 1>, scalar_prefetch = 0 : i64, scratch_operands = 0 : i64, tpu.core_type = #tpu.core_type<tc>, window_params = [{transform_indices = @transform_0, window_bounds = array<i64: 8, 16>}, {pipeline_mode = #tpu.pipeline_mode<synchronous>, transform_indices = @transform_1, window_bounds = array<i64: 16, 64>}, {pipeline_mode = #tpu.pipeline_mode<synchronous>, transform_indices = @transform_2, window_bounds = array<i64: 1, 64>}, {pipeline_mode = #tpu.pipeline_mode<synchronous>, transform_indices = @transform_3, window_bounds = array<i64: 64, 64>}, {pipeline_mode = #tpu.pipeline_mode<synchronous>, transform_indices = @transform_4, window_bounds = array<i64: 1, 64>}, {pipeline_mode = #tpu.pipeline_mode<synchronous>, transform_indices = @transform_5, window_bounds = array<i64: 64, 6>}, {pipeline_mode = #tpu.pipeline_mode<synchronous>, transform_indices = @transform_6, window_bounds = array<i64: 1, 6>}, {transform_indices = @transform_7, window_bounds = array<i64: 8, 6>}]} {
    %c0 = arith.constant 0 : index
    %c0_0 = arith.constant 0 : index
    %0 = vector.load %arg1[%c0, %c0_0] : memref<8x16xf32, #tpu.memory_space<vmem>>, vector<8x16xf32>
    %c0_1 = arith.constant 0 : index
    %c0_2 = arith.constant 0 : index
    %1 = vector.load %arg2[%c0_1, %c0_2] : memref<16x64xf32, #tpu.memory_space<vmem>>, vector<16x64xf32>
    %cst = arith.constant dense<0.000000e+00> : vector<8x64xf32>
    %2 = tpu.matmul %0, %1, %cst {dimension_numbers = #tpu.dot_dimension_numbers<[1], [0], [0], [1], [0, 0, 1, 1], [], []>} : vector<8x16xf32>, vector<16x64xf32>, vector<8x64xf32> -> vector<8x64xf32>
    %c0_3 = arith.constant 0 : index
    %c0_4 = arith.constant 0 : index
    %3 = vector.load %arg3[%c0_3, %c0_4] : memref<1x64xf32, #tpu.memory_space<vmem>>, vector<1x64xf32>
    %4 = vector.broadcast %3 : vector<1x64xf32> to vector<8x64xf32>
    %5 = arith.addf %2, %4 : vector<8x64xf32>
    %6 = math.tanh %5 : vector<8x64xf32>
    %c0_5 = arith.constant 0 : index
    %c0_6 = arith.constant 0 : index
    %7 = vector.load %arg4[%c0_5, %c0_6] : memref<64x64xf32, #tpu.memory_space<vmem>>, vector<64x64xf32>
    %cst_7 = arith.constant dense<0.000000e+00> : vector<8x64xf32>
    %8 = tpu.matmul %6, %7, %cst_7 {dimension_numbers = #tpu.dot_dimension_numbers<[1], [0], [0], [1], [0, 0, 1, 1], [], []>} : vector<8x64xf32>, vector<64x64xf32>, vector<8x64xf32> -> vector<8x64xf32>
    %c0_8 = arith.constant 0 : index
    %c0_9 = arith.constant 0 : index
    %9 = vector.load %arg5[%c0_8, %c0_9] : memref<1x64xf32, #tpu.memory_space<vmem>>, vector<1x64xf32>
    %10 = vector.broadcast %9 : vector<1x64xf32> to vector<8x64xf32>
    %11 = arith.addf %8, %10 : vector<8x64xf32>
    %12 = math.tanh %11 : vector<8x64xf32>
    %c0_10 = arith.constant 0 : index
    %c0_11 = arith.constant 0 : index
    %13 = vector.load %arg6[%c0_10, %c0_11] : memref<64x6xf32, #tpu.memory_space<vmem>>, vector<64x6xf32>
    %cst_12 = arith.constant dense<0.000000e+00> : vector<8x6xf32>
    %14 = tpu.matmul %12, %13, %cst_12 {dimension_numbers = #tpu.dot_dimension_numbers<[1], [0], [0], [1], [0, 0, 1, 1], [], []>} : vector<8x64xf32>, vector<64x6xf32>, vector<8x6xf32> -> vector<8x6xf32>
    %c0_13 = arith.constant 0 : index
    %c0_14 = arith.constant 0 : index
    %15 = vector.load %arg7[%c0_13, %c0_14] : memref<1x6xf32, #tpu.memory_space<vmem>>, vector<1x6xf32>
    %16 = vector.broadcast %15 : vector<1x6xf32> to vector<8x6xf32>
    %17 = arith.addf %14, %16 : vector<8x6xf32>
    %c0_15 = arith.constant 0 : index
    %c0_16 = arith.constant 0 : index
    %18 = vector.load %arg8[%c0_15, %c0_16] : memref<8x6xf32, #tpu.memory_space<vmem>>, vector<8x6xf32>
    tpu.vector_store %arg8[%c0_15, %c0_16], %17 {strides = array<i32>} : memref<8x6xf32, #tpu.memory_space<vmem>>, vector<8x6xf32>,
    return
  }
  func.func @transform_0(%arg0: i32) -> (i32, i32) {
    %c0_i32 = arith.constant 0 : i32
    %c0_i32_0 = arith.constant 0 : i32
    return %arg0, %c0_i32 : i32, i32
  }
  func.func @transform_1(%arg0: i32) -> (i32, i32) {
    %c0_i32 = arith.constant 0 : i32
    %c0_i32_0 = arith.constant 0 : i32
    %c0_i32_1 = arith.constant 0 : i32
    return %c0_i32, %c0_i32_0 : i32, i32
  }
  func.func @transform_2(%arg0: i32) -> (i32, i32) {
    %c0_i32 = arith.constant 0 : i32
    %c0_i32_0 = arith.constant 0 : i32
    %c0_i32_1 = arith.constant 0 : i32
    return %c0_i32, %c0_i32_0 : i32, i32
  }
  func.func @transform_3(%arg0: i32) -> (i32, i32) {
    %c0_i32 = arith.constant 0 : i32
    %c0_i32_0 = arith.constant 0 : i32
    %c0_i32_1 = arith.constant 0 : i32
    return %c0_i32, %c0_i32_0 : i32, i32
  }
  func.func @transform_4(%arg0: i32) -> (i32, i32) {
    %c0_i32 = arith.constant 0 : i32
    %c0_i32_0 = arith.constant 0 : i32
    %c0_i32_1 = arith.constant 0 : i32
    return %c0_i32, %c0_i32_0 : i32, i32
  }
  func.func @transform_5(%arg0: i32) -> (i32, i32) {
    %c0_i32 = arith.constant 0 : i32
    %c0_i32_0 = arith.constant 0 : i32
    %c0_i32_1 = arith.constant 0 : i32
    return %c0_i32, %c0_i32_0 : i32, i32
  }
  func.func @transform_6(%arg0: i32) -> (i32, i32) {
    %c0_i32 = arith.constant 0 : i32
    %c0_i32_0 = arith.constant 0 : i32
    %c0_i32_1 = arith.constant 0 : i32
    return %c0_i32, %c0_i32_0 : i32, i32
  }
  func.func @transform_7(%arg0: i32) -> (i32, i32) {
    %c0_i32 = arith.constant 0 : i32
    %c0_i32_0 = arith.constant 0 : i32
    return %arg0, %c0_i32 : i32, i32
  }
}

</mosaic_0001>

<bundles_post_ra>
// kernel: mlp_actor_forward.1
= control target key start
LH: loop header
LB: loop body
LE: loop exit
PB: predicated region body
PF: predicated region fallthrough
CT: control target
= control target key end

     0   :  { %12 = vsyncpa [#allocation3], 0  ;;  %s619_s0 = inlined_call_operand.vmem [shape: f32[8,16], index: 0, kind: input, shape index: {}]   ;;  %s620_s1 = inlined_call_operand.hbm [shape: f32[16,64], index: 1, kind: input, shape index: {}]   ;;  %s621_s2 = inlined_call_operand.vmem [shape: f32[1,64], index: 2, kind: input, shape index: {}]   ;;  %s622_s3 = inlined_call_operand.vmem [shape: f32[64,64], index: 3, kind: input, shape index: {}]   ;;  %s623_s4 = inlined_call_operand.hbm [shape: f32[1,64], index: 4, kind: input, shape index: {}]   ;;  %s624_s5 = inlined_call_operand.vmem [shape: f32[64,6], index: 5, kind: input, shape index: {}]   ;;  %s625_s6 = inlined_call_operand.vmem [shape: f32[1,6], index: 6, kind: input, shape index: {}]   ;;  %s626_s7 = inlined_call_operand.hbm [shape: f32[8,6], index: 7, kind: output, shape index: {}]  }
   0x1   :  { %13 = vsyncpa [#allocation6], 0 }
   0x2   :  { %14 = vsyncpa [#allocation4], 0  ;;  %s483_s24 = smov [#allocation2]  }
   0x3   :  { %s22_s25 = sshll.u32 %s483_s24, 4  ;;  %s23_s25 = int_to_ptr.vmem [resolvable:$true] %s22_s25 }
   0x4   :  { %s425_s26 = scalar_lea.vmem %s23_s25, 256  ;;  %p430_p1 = scmp.lt.s32.totalorder %s23_s25, %s23_s25 }
   0x5   :  { %p426_p0 = scmp.ne.s32.totalorder %s23_s25, %s425_s26  ;;  %p431_p2 = scmp.lt.s32.totalorder %s425_s26, %s425_s26 }
   0x7   :  { %p432_p3 = por %p431_p2, %p430_p1 }
   0x9   :  { %p433_p4 = pnand %p432_p3, %p426_p0 }
   0xb   :  { %436 = shalt.err (!%p433_p4)
}
   0xc   :  { %s484_s27 = smov 128   ;;  %s485_s28 = smov 8  }
   0xd   :  { %28 = dma.hbm_to_vmem [thread:$0]  %s620_s1, 256, %s23_s25, [#allocation3], %s484_s27, %s484_s27, %s485_s28  }
   0xe   :  { %s486_s8 = smov [#allocation5]  }
   0xf   :  { %s39_s9 = sshll.u32 %s486_s8, 4  ;;  %s40_s9 = int_to_ptr.vmem [resolvable:$true] %s39_s9 }
  0x10   :  { %s445_s10 = scalar_lea.vmem %s40_s9, 16  ;;  %s449_s11 = scalar_lea.vmem %s40_s9, 32 }
  0x11   :  { %p446_p5 = scmp.ne.s32.totalorder %s40_s9, %s445_s10  ;;  %p450_p6 = scmp.lt.s32.totalorder %s40_s9, %s40_s9 }
  0x12   :  { %p451_p7 = scmp.lt.s32.totalorder %s449_s11, %s445_s10 }
  0x14   :  { %p452_p8 = por %p451_p7, %p450_p6 }
  0x16   :  { %p453_p9 = pnand %p452_p8, %p446_p5 }
  0x18   :  { %456 = shalt.err (!%p453_p9)
}
  0x19   :  { %42 = dma.hbm_to_vmem [thread:$0]  %s623_s4, 16, %s40_s9, [#allocation6]  }
  0x1a   :  { %477 = dma.done.wait [#allocation3], 256  }
  0x1b   :  { %478 = vsyncadd [#allocation3], 4294967040 }
  0x1c   :  { %479 = dma.done.wait [#allocation6], 16  }
  0x1d   :  { %480 = vsyncadd [#allocation6], 4294967280  ;;  %v487_v0 = vmov 0.0   ;;  %vm488_vm0 = vmmov 0   ;;  %v55_v1 = vld [vmem:[#allocation2 + $0x8] sm:$0xff]  ;;  %v54_v2 = vld [vmem:[#allocation2] sm:$0xff] }
  0x1e   :  { %361 = vmatprep.subr.mxu0 %v487_v0  ;;  %365 = vmatprep.mubr.msk.f32.mxu0 %vm488_vm0, %v487_v0  ;;  %v53_v3 = vld [vmem:[%s619_s0] sm:$0xff]  ;;  %vm63_vm1 = vcmask 130048   ;;  %v145_v4 = vld [vmem:[%s622_s3 + $0x38] sm:$0xff]  ;;  %v144_v5 = vld [vmem:[%s622_s3 + $0x30] sm:$0xff]  ;;  %vm153_vm2 = vcmask 523264   ;;  %s489_s21 = smov [#allocation7]  }
  0x1f   :  { %368 = vmatprep.subr.mxu1 %v487_v0  ;;  %384 = vmatprep.mubr.msk.f32.mxu1 %vm488_vm0, %v487_v0  ;;  %v143_v6 = vld [vmem:[%s622_s3 + $0x28] sm:$0xff]  ;;  %v142_v7 = vld [vmem:[%s622_s3 + $0x20] sm:$0xff]  ;;  %v141_v8 = vld [vmem:[%s622_s3 + $0x18] sm:$0xff]  ;;  %s324_s22 = sshll.u32 %s489_s21, 4  ;;  %vm316_vm3 = vcmask 48128   ;;  %s325_s22 = int_to_ptr.vmem [resolvable:$true] %s324_s22 }
  0x20   :  { %362 = vmatpush3.msra.mxu0 %v55_v1  ;;  %369 = vmatpush3.msra.mxu1 %v145_v4  ;;  %v140_v9 = vld [vmem:[%s622_s3 + $0x10] sm:$0xff]  ;;  %v139_v10 = vld [vmem:[%s622_s3 + $0x8] sm:$0xff]  ;;  %v138_v11 = vld [vmem:[%s622_s3] sm:$0xff]  ;;  %p462_p11 = scmp.lt.s32.totalorder %s325_s22, %s325_s22 }
  0x21   :  { %363 = vmatprep.subr.mxu0 %v487_v0  ;;  %370 = vmatprep.subr.mxu1 %v487_v0  ;;  %v334_v12 = vld [vmem:[%s621_s2] ss:$0 sm:$0xff]  ;;  %v235_v17 = vld [vmem:[%s624_s5 + $0x38] sm:$0xff]  ;;  %v234_v18 = vld [vmem:[%s624_s5 + $0x30] sm:$0xff] }
  0x22   :  { %364 = vmatpush3.msra.mxu0 %v54_v2  ;;  %371 = vmatpush3.msra.mxu1 %v144_v5  ;;  %v233_v19 = vld [vmem:[%s624_s5 + $0x28] sm:$0xff]  ;;  %v232_v20 = vld [vmem:[%s624_s5 + $0x20] sm:$0xff]  ;;  %v231_v21 = vld [vmem:[%s624_s5 + $0x18] sm:$0xff] }
  0x23   :  { %366 = vmatmul.mubr.msk.f32.vlgmr.msra.gmra.mxu0 %vm63_vm1, %v53_v3  ;;  %387 = vmatprep.subr.mxu0 %v487_v0  ;;  %v230_v22 = vld [vmem:[%s624_s5 + $0x10] sm:$0xff]  ;;  %v229_v23 = vld [vmem:[%s624_s5 + $0x8] sm:$0xff]  ;;  %v228_v24 = vld [vmem:[%s624_s5] sm:$0xff]  ;;  %s457_s5 = scalar_lea.vmem %s325_s22, 128 }
  0x24   :  { %403 = vmatprep.mubr.msk.f32.mxu0 %vm488_vm0, %v487_v0  ;;  %372 = vmatprep.subr.mxu1 %v487_v0  ;;  %v336_v25 = vld [vmem:[#allocation5] ss:$0 sm:$0xff]  ;;  %v338_v30 = vld [vmem:[%s625_s6] ss:$0 sm:$0xff]  ;;  %p458_p10 = scmp.ne.s32.totalorder %s325_s22, %s457_s5  ;;  %p463_p12 = scmp.lt.s32.totalorder %s457_s5, %s457_s5 }
  0x25   :  { %373 = vmatpush3.msra.mxu1 %v143_v6  ;;  %388 = vmatpush3.msra.mxu0 %v235_v17 }
  0x26   :  { %374 = vmatprep.subr.mxu1 %v487_v0  ;;  %389 = vmatprep.subr.mxu0 %v487_v0  ;;  %p464_p13 = por %p463_p12, %p462_p11 }
  0x27   :  { %375 = vmatpush3.msra.mxu1 %v142_v7  ;;  %390 = vmatpush3.msra.mxu0 %v234_v18 }
  0x28   :  { %376 = vmatprep.subr.mxu1 %v487_v0  ;;  %391 = vmatprep.subr.mxu0 %v487_v0  ;;  %p465_p0 = pnand %p464_p13, %p458_p10 }
  0x29   :  { %377 = vmatpush3.msra.mxu1 %v141_v8  ;;  %392 = vmatpush3.msra.mxu0 %v233_v19 }
  0x2a   :  { %378 = vmatprep.subr.mxu1 %v487_v0  ;;  %393 = vmatprep.subr.mxu0 %v487_v0 }
  0x2b   :  { %379 = vmatpush3.msra.mxu1 %v140_v9  ;;  %394 = vmatpush3.msra.mxu0 %v232_v20 }
  0x2c   :  { %380 = vmatprep.subr.mxu1 %v487_v0  ;;  %395 = vmatprep.subr.mxu0 %v487_v0 }
  0x2d   :  { %381 = vmatpush3.msra.mxu1 %v139_v10  ;;  %396 = vmatpush3.msra.mxu0 %v231_v21 }
  0x2e   :  { %382 = vmatprep.subr.mxu1 %v487_v0  ;;  %397 = vmatprep.subr.mxu0 %v487_v0 }
  0x2f   :  { %383 = vmatpush3.msra.mxu1 %v138_v11  ;;  %398 = vmatpush3.msra.mxu0 %v230_v22 }
  0x30   :  { %399 = vmatprep.subr.mxu0 %v487_v0 }
  0x31   :  { %400 = vmatpush3.msra.mxu0 %v229_v23 }
  0x32   :  { %401 = vmatprep.subr.mxu0 %v487_v0 }
  0x33   :  { %402 = vmatpush3.msra.mxu0 %v228_v24 }
  0xe3   :  { %v133_v13 = vpop.f32.mrf.mxu0 }
  0xe4   :  { %v134_v14 = vadd.f32 %v334_v12, %v133_v13 }
  0xe5   :  { %v367_v15 = vpop.f32.mrf.mxu0 }
  0xe6   :  { %413 = vtanh.f32 %v134_v14 }
  0xf3   :  { %v414_v16 = vpop.eup %413 }
  0xf4   :  { %385 = vmatmul.mubr.msk.f32.vlgmr.msra.gmra.mxu1 %vm153_vm2, %v414_v16 }
 0x1b4   :  { %v223_v26 = vpop.f32.mrf.mxu1 }
 0x1b5   :  { %v224_v27 = vadd.f32 %v336_v25, %v223_v26 }
 0x1b6   :  { %v386_v28 = vpop.f32.mrf.mxu1 }
 0x1b7   :  { %415 = vtanh.f32 %v224_v27 }
 0x1c4   :  { %v416_v29 = vpop.eup %415 }
 0x1c5   :  { %404 = vmatmul.mubr.msk.f32.vlgmr.msra.gmra.mxu0 %vm153_vm2, %v416_v29 }
 0x285   :  { %v312_v31 = vpop.f32.mrf.mxu0 }
 0x286   :  { %v313_v32 = vadd.f32 %v338_v30, %v312_v31 }
 0x287   :  { %v405_v33 = vpop.f32.mrf.mxu0 }
 0x288   :  { %317 = vst.msk [vmem:[#allocation7] sm:$0xff] %vm316_vm3, %v313_v32 }
 0x289   :  { %468 = shalt.err (!%p465_p0)
}
 0x28a   :  { %327 = dma.vmem_to_hbm [thread:$0]  %s325_s22, 128, %s626_s7, [#allocation4]  }
 0x28b   :  { %481 = dma.done.wait [#allocation4], 128  }
 0x28c   :  { %482 = vsyncadd [#allocation4], 4294967168 }
 0x28d   :  { %331 = vsyncpa [#allocation3], 1 }
 0x28e   :  { %332 = vsyncpa [#allocation6], 1 }
 0x28f   :  { %333 = vsyncpa [#allocation4], 1 }

</bundles_post_ra>
